<compile_context>
chip_gen: v7x
topology: tpu7x:2x2x1
jax: 0.10.0
libtpu: 0.0.40
codegen_flags: <defaults>
</compile_context>

<pallas_src>
import math
import functools

import jax
import jax.numpy as jnp
from jax.experimental import pallas as pl
from jax.experimental.pallas import tpu as pltpu


def _round_up(x, m):
    return ((x + m - 1) // m) * m


def _cdiv(a, b):
    return -(-a // b)


def _flash_attention_kernel(vl_ref, q_ref, k_ref, v_ref, o_ref,
                            m_sc, l_sc, acc_sc, *,
                            tk, k_orig, sm_scale, mask_valid, mask_pad):
    b = pl.program_id(0)
    kv = pl.program_id(2)

    @pl.when(kv == 0)
    def _init():
        m_sc[...] = jnp.full_like(m_sc, -jnp.inf)
        l_sc[...] = jnp.zeros_like(l_sc)
        acc_sc[...] = jnp.zeros_like(acc_sc)

    if mask_valid:
        vl_b = vl_ref[b]
        # Skip K tiles that lie entirely past valid_len: their contribution is
        # exactly 0 (exp(-1e6 - m) underflows in f32).  valid_len == 0 is the
        # degenerate reference case (uniform average) and must NOT be skipped.
        live = jnp.logical_or(kv * tk < vl_b, vl_b <= 0)
    else:
        vl_b = None
        live = None

    def _compute():
        # Fold the softmax scale into q: a (TQ, D) multiply instead of a
        # (TQ, TK) pass over the score tile on every K step.  The weak-typed
        # Python float keeps q's dtype (f32 or bf16).
        q = q_ref[0] * sm_scale       # (TQ, D)
        k = k_ref[0]                  # (TK, D)
        v = v_ref[0]                  # (TK, Dv)

        # scores = q_scaled @ K^T: contract over D directly so the MXU
        # consumes the transposed operand natively (no XLU transpose).
        s = jax.lax.dot_general(
            q, k, (((1,), (1,)), ((), ())),
            preferred_element_type=jnp.float32)            # (TQ, TK)

        # Single fused masking pass (one select over the score tile).
        if mask_valid or mask_pad:
            col = jax.lax.broadcasted_iota(jnp.int32, (1, tk), 1)
        if mask_valid:
            if mask_pad:
                # Real-but-masked columns get the reference's -1e6; tile-pad
                # columns get -inf so they contribute nothing even in the
                # valid_len == 0 (uniform-average) case.
                neg = jnp.where(col < (k_orig - kv * tk),
                                jnp.float32(-1000000.0), -jnp.inf)
            else:
                neg = jnp.float32(-1000000.0)
            s = jnp.where(col < (vl_b - kv * tk), s, neg)
        elif mask_pad:
            s = jnp.where(col < (k_orig - kv * tk), s, -jnp.inf)

        # Online (flash) softmax update.
        m_prev = m_sc[...]
        m_new = jnp.maximum(m_prev, jnp.max(s, axis=-1, keepdims=True))
        alpha = jnp.exp(m_prev - m_new)
        p = jnp.exp(s - m_new)
        l_sc[...] = alpha * l_sc[...] + jnp.sum(p, axis=-1, keepdims=True)
        acc_sc[...] = alpha * acc_sc[...] + jnp.dot(
            p.astype(v.dtype), v, preferred_element_type=jnp.float32)
        m_sc[...] = m_new

    if mask_valid:
        pl.when(live)(_compute)
    else:
        _compute()

    # TODO(synk): nn.Dropout on the attention weights is identity at inference
    # time; training-mode dropout (pltpu.prng_*) is not implemented here.

    @pl.when(kv == pl.num_programs(2) - 1)
    def _finalize():
        # Epilogue only (once per (batch, Q-tile)); exact reciprocal is off
        # the inner loop and keeps strict f32 parity.
        inv_l = pl.reciprocal(l_sc[...], approx=False)
        o_ref[0] = (acc_sc[...] * inv_l).astype(o_ref.dtype)


@functools.partial(jax.jit, static_argnames=("tq", "tk"))
def dot_product_attention(query, key, value, valid_len=None, *, tq=512, tk=256):
    """Pallas flash-style implementation of DotProductAttention.forward (eval)."""
    B, Q, D = query.shape
    _, K, Dk = key.shape
    _, _, Dv = value.shape
    assert Dk == D and key.shape[0] == B and value.shape[:2] == (B, K)

    # TODO(synk): only the per-batch 1-D valid_len form is supported; the
    # 2-D per-query valid_len variant of masked_softmax is not implemented.

    # Sublane multiple depends on dtype packing (8 f32, 16 bf16, 32 int8/fp8).
    itemsize = jnp.dtype(query.dtype).itemsize
    sub = max(8, 32 // itemsize)

    # Tile sizes: full (sublane-aligned) extent when the axis is small,
    # otherwise the requested flash tile.  TQ defaults high because K/V are
    # re-streamed from HBM once per Q tile; TK=256 matches the 256-wide MXU
    # on v6e/v7x and keeps the (TQ,TK) f32 score temporaries small.
    TQ = tq if Q >= tq else _round_up(Q, sub)
    TK = tk if K >= tk else _round_up(K, sub)
    # v7x has two TensorCores and only the B / Q-tile axes are "parallel":
    # shrink TQ (down to 128) until at least two parallel grid points exist.
    while B * _cdiv(Q, TQ) < 2 and TQ > max(sub, 128):
        TQ = max(_round_up(TQ // 2, sub), max(sub, 128))

    Q_pad = _round_up(Q, TQ)
    K_pad = _round_up(K, TK)

    if Q_pad != Q:
        query = jnp.pad(query, ((0, 0), (0, Q_pad - Q), (0, 0)))
    if K_pad != K:
        key = jnp.pad(key, ((0, 0), (0, K_pad - K), (0, 0)))
        value = jnp.pad(value, ((0, 0), (0, K_pad - K), (0, 0)))

    has_valid = valid_len is not None
    if has_valid:
        vl = valid_len.astype(jnp.int32)
    else:
        vl = jnp.full((B,), K, dtype=jnp.int32)   # never read in the kernel

    kernel = functools.partial(
        _flash_attention_kernel,
        tk=TK, k_orig=K, sm_scale=1.0 / math.sqrt(D),
        mask_valid=has_valid, mask_pad=(K_pad != K))

    num_k_tiles = K_pad // TK
    q_tiles = Q_pad // TQ
    grid = (B, q_tiles, num_k_tiles)

    # Triple-buffer the streamed K / V blocks when the K axis is long enough:
    # for small D the per-K-tile compute is short and the fetch can be exposed.
    if num_k_tiles >= 3:
        k_spec = pl.BlockSpec((1, TK, D), lambda b, qi, ki, _vl: (b, ki, 0),
                              pipeline_mode=pl.Buffered(3))
        v_spec = pl.BlockSpec((1, TK, Dv), lambda b, qi, ki, _vl: (b, ki, 0),
                              pipeline_mode=pl.Buffered(3))
    else:
        k_spec = pl.BlockSpec((1, TK, D), lambda b, qi, ki, _vl: (b, ki, 0))
        v_spec = pl.BlockSpec((1, TK, Dv), lambda b, qi, ki, _vl: (b, ki, 0))

    grid_spec = pltpu.PrefetchScalarGridSpec(
        num_scalar_prefetch=1,                          # valid_len -> SMEM
        grid=grid,
        in_specs=[
            pl.BlockSpec((1, TQ, D), lambda b, qi, ki, _vl: (b, qi, 0)),
            k_spec,
            v_spec,
        ],
        out_specs=pl.BlockSpec((1, TQ, Dv), lambda b, qi, ki, _vl: (b, qi, 0)),
        scratch_shapes=[
            pltpu.VMEM((TQ, 1), jnp.float32),   # running max
            pltpu.VMEM((TQ, 1), jnp.float32),   # running denominator
            pltpu.VMEM((TQ, Dv), jnp.float32),  # running numerator
        ],
    )

    # TODO(synk): for Dv < 128 a lane-dense output (e.g. heads folded into the
    # last dim by the caller) would avoid masked partial stores in the epilogue.

    cost = pl.CostEstimate(
        flops=2 * B * Q_pad * K_pad * (D + Dv),
        transcendentals=B * Q_pad * K_pad,
        # K and V are re-read from HBM once per Q tile.
        bytes_accessed=itemsize * (query.size
                                   + q_tiles * (key.size + value.size)
                                   + B * Q_pad * Dv),
    )

    out = pl.pallas_call(
        kernel,
        out_shape=jax.ShapeDtypeStruct((B, Q_pad, Dv), query.dtype),
        grid_spec=grid_spec,
        compiler_params=pltpu.CompilerParams(
            # B and Q-tile axes shard across TensorCores (matters on v7x);
            # the K axis carries the online-softmax state -> "arbitrary".
            dimension_semantics=("parallel", "parallel", "arbitrary"),
            # Resident blocks are a few MiB; 48 MiB leaves headroom even on
            # v7x's 64 MiB physical VMEM per TensorCore.
            vmem_limit_bytes=48 * 1024 * 1024,
        ),
        cost_estimate=cost,
    )(vl, query, key, value)

    return out[:, :Q, :] if Q_pad != Q else out


def _reference(query, key, value, valid_len=None):
    """Pure-JAX reference mirroring the PyTorch module semantics."""
    d = query.shape[-1]
    scores = jnp.einsum("bqd,bkd->bqk", query, key) / math.sqrt(d)
    if valid_len is not None:
        K = scores.shape[-1]
        mask = jnp.arange(K)[None, None, :] < valid_len[:, None, None]
        scores = jnp.where(mask, scores, -1000000.0)
    w = jax.nn.softmax(scores, axis=-1)
    return jnp.einsum("bqk,bkv->bqv", w, value)


if __name__ == "__main__":
    # Case 1: the module's nominal small shapes, masked softmax.
    B, Q, K, D, Dv = 2, 8, 8, 32, 32
    kq, kk, kvv = jax.random.split(jax.random.PRNGKey(0), 3)
    q1 = jax.random.normal(kq, (B, Q, D), dtype=jnp.float32)
    k1 = jax.random.normal(kk, (B, K, D), dtype=jnp.float32)
    v1 = jax.random.normal(kvv, (B, K, Dv), dtype=jnp.float32)
    vl1 = jnp.array([3, 6], dtype=jnp.int32)
    o1 = jax.block_until_ready(dot_product_attention(q1, k1, v1, vl1))
    r1 = _reference(q1, k1, v1, vl1)
    assert o1.shape == (B, Q, Dv)
    assert jnp.allclose(o1, r1, atol=2e-5, rtol=2e-5), "case1 mismatch"

    # Case 2: multi-tile online softmax with Q/K padding, valid-len masking,
    # tile-skipping and the Buffered(3) K/V pipeline (3 K tiles).
    B, Q, K, D, Dv = 2, 12, 20, 32, 64
    kq, kk, kvv = jax.random.split(jax.random.PRNGKey(1), 3)
    q2 = jax.random.normal(kq, (B, Q, D), dtype=jnp.float32)
    k2 = jax.random.normal(kk, (B, K, D), dtype=jnp.float32)
    v2 = jax.random.normal(kvv, (B, K, Dv), dtype=jnp.float32)
    vl2 = jnp.array([5, 20], dtype=jnp.int32)
    o2 = jax.block_until_ready(dot_product_attention(q2, k2, v2, vl2, tq=8, tk=8))
    r2 = _reference(q2, k2, v2, vl2)
    assert o2.shape == (B, Q, Dv)
    assert jnp.allclose(o2, r2, atol=2e-5, rtol=2e-5), "case2 mismatch"

    # Case 3: valid_len=None (no valid-len masking path, only pad masking).
    o3 = jax.block_until_ready(dot_product_attention(q2, k2, v2, None, tq=8, tk=8))
    r3 = _reference(q2, k2, v2, None)
    assert jnp.allclose(o3, r3, atol=2e-5, rtol=2e-5), "case3 mismatch"

    # Case 4: larger case exercising default tiles, fully-masked-tile skipping
    # and the degenerate valid_len == 0 (uniform-average) batch.
    B, Q, K, D, Dv = 2, 256, 640, 64, 128
    kq, kk, kvv = jax.random.split(jax.random.PRNGKey(2), 3)
    q4 = jax.random.normal(kq, (B, Q, D), dtype=jnp.float32)
    k4 = jax.random.normal(kk, (B, K, D), dtype=jnp.float32)
    v4 = jax.random.normal(kvv, (B, K, Dv), dtype=jnp.float32)
    vl4 = jnp.array([0, 500], dtype=jnp.int32)
    o4 = jax.block_until_ready(dot_product_attention(q4, k4, v4, vl4))
    r4 = _reference(q4, k4, v4, vl4)
    assert o4.shape == (B, Q, Dv)
    assert jnp.allclose(o4, r4, atol=2e-4, rtol=2e-4), "case4 mismatch"

    # Case 5: bf16 inputs (f32 accumulation and f32 online-softmax state).
    q5 = q2.astype(jnp.bfloat16)
    k5 = k2.astype(jnp.bfloat16)
    v5 = v2.astype(jnp.bfloat16)
    o5 = jax.block_until_ready(dot_product_attention(q5, k5, v5, vl2))
    r5 = _reference(q5.astype(jnp.float32), k5.astype(jnp.float32),
                    v5.astype(jnp.float32), vl2)
    assert jnp.allclose(o5.astype(jnp.float32), r5, atol=1e-1, rtol=1e-1), \
        "case5 mismatch"

    print("KERNEL_OK")
</pallas_src>

<mosaic_0001>
module attributes {stable_mosaic.version = 11 : i64} {
  func.func @_flash_attention_kernel(%arg0: i32, %arg1: i32, %arg2: i32, %arg3: memref<2xi32, #tpu.memory_space<smem>>, %arg4: memref<1x8x32xf32, #tpu.memory_space<vmem>>, %arg5: memref<1x8x32xf32, #tpu.memory_space<vmem>>, %arg6: memref<1x8x32xf32, #tpu.memory_space<vmem>>, %arg7: memref<1x8x32xf32, #tpu.memory_space<vmem>>, %arg8: memref<8x1xf32, #tpu.memory_space<vmem>>, %arg9: memref<8x1xf32, #tpu.memory_space<vmem>>, %arg10: memref<8x32xf32, #tpu.memory_space<vmem>>) attributes {dimension_semantics = [#tpu.dimension_semantics<parallel>, #tpu.dimension_semantics<parallel>, #tpu.dimension_semantics<arbitrary>], iteration_bounds = array<i64: 2, 1, 1>, scalar_prefetch = 1 : i64, scratch_operands = 3 : i64, tpu.core_type = #tpu.core_type<tc>, window_params = [{transform_indices = @transform_0, window_bounds = array<i64: 1, 8, 32>}, {transform_indices = @transform_1, window_bounds = array<i64: 1, 8, 32>}, {transform_indices = @transform_2, window_bounds = array<i64: 1, 8, 32>}, {transform_indices = @transform_3, window_bounds = array<i64: 1, 8, 32>}]} {
    %c0_i32 = arith.constant 0 : i32
    %0 = arith.cmpi eq, %arg2, %c0_i32 : i32
    %1 = arith.extui %0 : i1 to i32
    %c0_i32_0 = arith.constant 0 : i32
    %2 = arith.cmpi ne, %1, %c0_i32_0 : i32
    scf.if %2 {
      %cst = arith.constant 0xFF800000 : f32
      %14 = vector.broadcast %cst : f32 to vector<8x1xf32>
      %c0 = arith.constant 0 : index
      %c0_5 = arith.constant 0 : index
      %15 = vector.load %arg8[%c0, %c0_5] : memref<8x1xf32, #tpu.memory_space<vmem>>, vector<8x1xf32>
      tpu.vector_store %arg8[%c0, %c0_5], %14 {strides = array<i32>} : memref<8x1xf32, #tpu.memory_space<vmem>>, vector<8x1xf32>,
      %cst_6 = arith.constant 0.000000e+00 : f32
      %16 = vector.broadcast %cst_6 : f32 to vector<8x1xf32>
      %c0_7 = arith.constant 0 : index
      %c0_8 = arith.constant 0 : index
      %17 = vector.load %arg9[%c0_7, %c0_8] : memref<8x1xf32, #tpu.memory_space<vmem>>, vector<8x1xf32>
      tpu.vector_store %arg9[%c0_7, %c0_8], %16 {strides = array<i32>} : memref<8x1xf32, #tpu.memory_space<vmem>>, vector<8x1xf32>,
      %cst_9 = arith.constant 0.000000e+00 : f32
      %18 = vector.broadcast %cst_9 : f32 to vector<8x32xf32>
      %c0_10 = arith.constant 0 : index
      %c0_11 = arith.constant 0 : index
      %19 = vector.load %arg10[%c0_10, %c0_11] : memref<8x32xf32, #tpu.memory_space<vmem>>, vector<8x32xf32>
      tpu.vector_store %arg10[%c0_10, %c0_11], %18 {strides = array<i32>} : memref<8x32xf32, #tpu.memory_space<vmem>>, vector<8x32xf32>,
    } else {
    }
    %3 = arith.index_cast %arg0 : i32 to index
    %4 = memref.load %arg3[%3] : memref<2xi32, #tpu.memory_space<smem>>
    %c8_i32 = arith.constant 8 : i32
    %5 = arith.muli %arg2, %c8_i32 : i32
    %6 = arith.cmpi slt, %5, %4 : i32
    %c0_i32_1 = arith.constant 0 : i32
    %7 = arith.cmpi sle, %4, %c0_i32_1 : i32
    %8 = arith.ori %6, %7 : i1
    %9 = arith.extui %8 : i1 to i32
    %c0_i32_2 = arith.constant 0 : i32
    %10 = arith.cmpi ne, %9, %c0_i32_2 : i32
    scf.if %10 {
      %c0 = arith.constant 0 : index
      %c0_5 = arith.constant 0 : index
      %c0_6 = arith.constant 0 : index
      %14 = vector.load %arg4[%c0, %c0_5, %c0_6] : memref<1x8x32xf32, #tpu.memory_space<vmem>>, vector<1x8x32xf32>
      %15 = vector.shape_cast %14 : vector<1x8x32xf32> to vector<8x32xf32>
      %cst = arith.constant 0.176776692 : f32
      %16 = vector.broadcast %cst : f32 to vector<8x32xf32>
      %17 = arith.mulf %15, %16 : vector<8x32xf32>
      %c0_7 = arith.constant 0 : index
      %c0_8 = arith.constant 0 : index
      %c0_9 = arith.constant 0 : index
      %18 = vector.load %arg5[%c0_7, %c0_8, %c0_9] : memref<1x8x32xf32, #tpu.memory_space<vmem>>, vector<1x8x32xf32>
      %19 = vector.shape_cast %18 : vector<1x8x32xf32> to vector<8x32xf32>
      %c0_10 = arith.constant 0 : index
      %c0_11 = arith.constant 0 : index
      %c0_12 = arith.constant 0 : index
      %20 = vector.load %arg6[%c0_10, %c0_11, %c0_12] : memref<1x8x32xf32, #tpu.memory_space<vmem>>, vector<1x8x32xf32>
      %21 = vector.shape_cast %20 : vector<1x8x32xf32> to vector<8x32xf32>
      %cst_13 = arith.constant dense<0.000000e+00> : vector<8x8xf32>
      %22 = tpu.matmul %17, %19, %cst_13 {dimension_numbers = #tpu.dot_dimension_numbers<[1], [1], [0], [0], [0, 0, 1, 0], [], []>} : vector<8x32xf32>, vector<8x32xf32>, vector<8x8xf32> -> vector<8x8xf32>
      %23 = tpu.iota {dimensions = array<i32: 1>} : vector<1x8xi32>
      %c8_i32_14 = arith.constant 8 : i32
      %24 = arith.muli %arg2, %c8_i32_14 : i32
      %25 = arith.subi %4, %24 : i32
      %26 = vector.broadcast %25 : i32 to vector<1x8xi32>
      %27 = arith.cmpi slt, %23, %26 : vector<1x8xi32>
      %cst_15 = arith.constant -1.000000e+06 : f32
      %28 = vector.shape_cast %27 : vector<1x8xi1> to vector<1x8xi1>
      %29 = vector.broadcast %28 : vector<1x8xi1> to vector<8x8xi1>
      %30 = vector.broadcast %cst_15 : f32 to vector<8x8xf32>
      %31 = arith.select %29, %22, %30 : vector<8x8xi1>, vector<8x8xf32>
      %c0_16 = arith.constant 0 : index
      %c0_17 = arith.constant 0 : index
      %32 = vector.load %arg8[%c0_16, %c0_17] : memref<8x1xf32, #tpu.memory_space<vmem>>, vector<8x1xf32>
      %cst_18 = arith.constant dense<0xFF800000> : vector<8xf32>
      %33 = vector.multi_reduction <maximumf>, %31, %cst_18 [1] : vector<8x8xf32> to vector<8xf32>
      %34 = vector.shape_cast %33 : vector<8xf32> to vector<8x1xf32>
      %35 = arith.maximumf %32, %34 : vector<8x1xf32>
      %36 = arith.subf %32, %35 : vector<8x1xf32>
      %37 = math.exp %36 : vector<8x1xf32>
      %38 = vector.broadcast %35 : vector<8x1xf32> to vector<8x8xf32>
      %39 = arith.subf %31, %38 : vector<8x8xf32>
      %40 = math.exp %39 : vector<8x8xf32>
      %c0_19 = arith.constant 0 : index
      %c0_20 = arith.constant 0 : index
      %41 = vector.load %arg9[%c0_19, %c0_20] : memref<8x1xf32, #tpu.memory_space<vmem>>, vector<8x1xf32>
      %42 = arith.mulf %37, %41 : vector<8x1xf32>
      %cst_21 = arith.constant dense<0.000000e+00> : vector<8xf32>
      %43 = vector.multi_reduction <add>, %40, %cst_21 [1] : vector<8x8xf32> to vector<8xf32>
      %44 = vector.shape_cast %43 : vector<8xf32> to vector<8x1xf32>
      %45 = arith.addf %42, %44 : vector<8x1xf32>
      %c0_22 = arith.constant 0 : index
      %c0_23 = arith.constant 0 : index
      %46 = vector.load %arg9[%c0_22, %c0_23] : memref<8x1xf32, #tpu.memory_space<vmem>>, vector<8x1xf32>
      tpu.vector_store %arg9[%c0_22, %c0_23], %45 {strides = array<i32>} : memref<8x1xf32, #tpu.memory_space<vmem>>, vector<8x1xf32>,
      %c0_24 = arith.constant 0 : index
      %c0_25 = arith.constant 0 : index
      %47 = vector.load %arg10[%c0_24, %c0_25] : memref<8x32xf32, #tpu.memory_space<vmem>>, vector<8x32xf32>
      %48 = vector.broadcast %37 : vector<8x1xf32> to vector<8x32xf32>
      %49 = arith.mulf %48, %47 : vector<8x32xf32>
      %cst_26 = arith.constant dense<0.000000e+00> : vector<8x32xf32>
      %50 = tpu.matmul %40, %21, %cst_26 {dimension_numbers = #tpu.dot_dimension_numbers<[1], [0], [0], [1], [0, 0, 1, 1], [], []>} : vector<8x8xf32>, vector<8x32xf32>, vector<8x32xf32> -> vector<8x32xf32>
      %51 = arith.addf %49, %50 : vector<8x32xf32>
      %c0_27 = arith.constant 0 : index
      %c0_28 = arith.constant 0 : index
      %52 = vector.load %arg10[%c0_27, %c0_28] : memref<8x32xf32, #tpu.memory_space<vmem>>, vector<8x32xf32>
      tpu.vector_store %arg10[%c0_27, %c0_28], %51 {strides = array<i32>} : memref<8x32xf32, #tpu.memory_space<vmem>>, vector<8x32xf32>,
      %c0_29 = arith.constant 0 : index
      %c0_30 = arith.constant 0 : index
      %53 = vector.load %arg8[%c0_29, %c0_30] : memref<8x1xf32, #tpu.memory_space<vmem>>, vector<8x1xf32>
      tpu.vector_store %arg8[%c0_29, %c0_30], %35 {strides = array<i32>} : memref<8x1xf32, #tpu.memory_space<vmem>>, vector<8x1xf32>,
    } else {
    }
    %c0_i32_3 = arith.constant 0 : i32
    %11 = arith.cmpi eq, %arg2, %c0_i32_3 : i32
    %12 = arith.extui %11 : i1 to i32
    %c0_i32_4 = arith.constant 0 : i32
    %13 = arith.cmpi ne, %12, %c0_i32_4 : i32
    scf.if %13 {
      %c0 = arith.constant 0 : index
      %c0_5 = arith.constant 0 : index
      %14 = vector.load %arg9[%c0, %c0_5] : memref<8x1xf32, #tpu.memory_space<vmem>>, vector<8x1xf32>
      %15 = tpu.reciprocal %14 : vector<8x1xf32> -> vector<8x1xf32>
      %c0_6 = arith.constant 0 : index
      %c0_7 = arith.constant 0 : index
      %16 = vector.load %arg10[%c0_6, %c0_7] : memref<8x32xf32, #tpu.memory_space<vmem>>, vector<8x32xf32>
      %17 = vector.broadcast %15 : vector<8x1xf32> to vector<8x32xf32>
      %18 = arith.mulf %16, %17 : vector<8x32xf32>
      %c0_8 = arith.constant 0 : index
      %c0_9 = arith.constant 0 : index
      %c0_10 = arith.constant 0 : index
      %19 = vector.load %arg7[%c0_8, %c0_9, %c0_10] : memref<1x8x32xf32, #tpu.memory_space<vmem>>, vector<1x8x32xf32>
      %20 = vector.shape_cast %19 : vector<1x8x32xf32> to vector<8x32xf32>
      %21 = vector.shape_cast %18 : vector<8x32xf32> to vector<1x8x32xf32>
      tpu.vector_store %arg7[%c0_8, %c0_9, %c0_10], %21 {strides = array<i32>} : memref<1x8x32xf32, #tpu.memory_space<vmem>>, vector<1x8x32xf32>,
    } else {
    }
    return
  }
  func.func @transform_0(%arg0: i32, %arg1: i32, %arg2: i32, %arg3: memref<2xi32, #tpu.memory_space<smem>>) -> (i32, i32, i32) {
    %c0_i32 = arith.constant 0 : i32
    %c0_i32_0 = arith.constant 0 : i32
    return %arg0, %arg1, %c0_i32 : i32, i32, i32
  }
  func.func @transform_1(%arg0: i32, %arg1: i32, %arg2: i32, %arg3: memref<2xi32, #tpu.memory_space<smem>>) -> (i32, i32, i32) {
    %c0_i32 = arith.constant 0 : i32
    %c0_i32_0 = arith.constant 0 : i32
    return %arg0, %arg2, %c0_i32 : i32, i32, i32
  }
  func.func @transform_2(%arg0: i32, %arg1: i32, %arg2: i32, %arg3: memref<2xi32, #tpu.memory_space<smem>>) -> (i32, i32, i32) {
    %c0_i32 = arith.constant 0 : i32
    %c0_i32_0 = arith.constant 0 : i32
    return %arg0, %arg2, %c0_i32 : i32, i32, i32
  }
  func.func @transform_3(%arg0: i32, %arg1: i32, %arg2: i32, %arg3: memref<2xi32, #tpu.memory_space<smem>>) -> (i32, i32, i32) {
    %c0_i32 = arith.constant 0 : i32
    %c0_i32_0 = arith.constant 0 : i32
    return %arg0, %arg1, %c0_i32 : i32, i32, i32
  }
}

</mosaic_0001>

<bundles_post_ra>
// kernel: dot_product_attention.1
= control target key start
LH: loop header
LB: loop body
LE: loop exit
PB: predicated region body
PF: predicated region fallthrough
CT: control target
= control target key end

     0   :  { %s1304_s0 = inlined_call_operand.vmem [shape: s32[2], index: 0, kind: input, shape index: {}]   ;;  %s1305_s1 = inlined_call_operand.hbm [shape: f32[2,8,32], index: 1, kind: input, shape index: {}]   ;;  %s1306_s2 = inlined_call_operand.hbm [shape: f32[2,8,32], index: 2, kind: input, shape index: {}]   ;;  %s1307_s3 = inlined_call_operand.hbm [shape: f32[2,8,32], index: 3, kind: input, shape index: {}]   ;;  %s1308_s4 = inlined_call_operand.hbm [shape: f32[2,8,32], index: 4, kind: output, shape index: {}]  }
   0x1   :  { %1314 = sst [smem:[#allocation21_spill]] %s1306_s2  ;;  %s9_s17 = sshll.u32 %s1304_s0, 4  ;;  %s10_s17 = int_to_ptr.vmem [resolvable:$true] %s9_s17 }
   0x2   :  { %s790_s18 = scalar_lea.vmem %s10_s17, 16  ;;  %p795_p1 = scmp.lt.s32.totalorder %s10_s17, %s10_s17 }
   0x3   :  { %p791_p0 = scmp.ne.s32.totalorder %s10_s17, %s790_s18  ;;  %p796_p2 = scmp.lt.s32.totalorder %s790_s18, %s790_s18 }
   0x5   :  { %p797_p3 = por %p796_p2, %p795_p1 }
   0x7   :  { %p798_p4 = pnand %p797_p3, %p791_p0 }
   0x9   :  { %801 = shalt.err (!%p798_p4)  }
   0xa   :  { %s982_s19 = smov [#allocation6]  }
   0xb   :  { %12 = dma.vmem_to_smem %s10_s17, 16, %s982_s19, [#allocation5] }
   0xc   :  { %944 = dma.done.wait [#allocation5], 16 }
   0xd   :  { %945 = vsyncadd [#allocation5], 4294967280 }
   0xe   :  { %14 = sfence }
   0xf   :  { %15 = vsyncpa [#allocation8], 0 }
  0x10   :  { %17 = vsyncpa [#allocation8 + $0x1], 0 }
  0x11   :  { %18 = vsyncpa [#allocation11], 0 }
  0x12   :  { %20 = vsyncpa [#allocation11 + $0x1], 0 }
  0x13   :  { %21 = vsyncpa [#allocation9], 0 }
  0x14   :  { %23 = vsyncpa [#allocation9 + $0x1], 0  ;;  %s1021_s0 = smov 0   ;;  %s1023_s20 = smov 0  }
  0x15   :  { %s1025_s21 = smov 0   ;;  %s1027_s22 = smov 0  }
  0x16   :  { %s1029_s23 = smov 0   ;;  %s1031_s24 = smov 0  }
  0x17 LB: > { %1315 = sst [smem:[#allocation18_spill]] %s976_s23  ;;  %s1052_s25 = sadd.s32 4294967295, %s980_s24   ;;  %s980_s24 = sphi %s1031_s24, %s29_s24   ;;  %s976_s23 = sphi %s1029_s23, %s1336_s23   ;;  %s972_s22 = sphi %s1027_s22, %s1335_s22   ;;  %s968_s21 = sphi %s1025_s21, %s1339_s21   ;;  %s964_s20 = sphi %s1023_s20, %s1338_s20   ;;  %s960_s0 = sphi %s1021_s0, %s1337_s0  }
  0x18   : > { %s666_s26 = sadd.s32 4294967294, %s980_s24   ;;  %s48_s27 = sadd.s32 1, %s976_s23 }
  0x19   : > { %s57_s28 = sadd.s32 1, %s968_s21  ;;  %p50_p5 = scmp.ge.s32.totalorder %s48_s27, 2 }
  0x1a   : > { %p64_p6 = scmp.ne.s32.totalorder %s968_s21, %s964_s20  ;;  %p65_p7 = scmp.eq.s32.totalorder %s980_s24, 0 }
  0x1b   : > { %p70_p8 = scmp.ne.s32.totalorder %s964_s20, %s960_s0  ;;  %s1341_s27 = smov (%p50_p5, %s48_s27), 0 }
  0x1c   : > { %1316 = sst [smem:[#allocation19_spill]] %s1341_s27  ;;  %p1064_p9 = por %p65_p7, %p64_p6 }
  0x1d   : > { %p71_p10 = scmp.eq.s32.totalorder %s1052_s25, 0  ;;  %s52_s30 = ssub.s32 %s976_s23, %s1341_s27 }
  0x1e   : > { %p152_p11 = scmp.eq.s32.totalorder %s1052_s25, 1  ;;  %p55_p12 = scmp.eq.s32.totalorder %s52_s30, 0 }
  0x1f   : > { %p1072_p13 = por %p71_p10, %p70_p8  ;;  %p158_p1 = scmp.eq.s32.totalorder %s666_s26, 1 }
  0x20   : > { %p1076_p0 = por %p152_p11, %p64_p6  ;;  %p724_p4 = scmp.lt.s32.totalorder %s980_s24, 2 }
  0x21   : > { %s1318_s5 = scalar_select %p1072_p13, 1, 0 }
  0x22   : > { %s1319_s6 = scalar_select %p1076_p0, 1, 0 }
  0x23   : > { %s1081_s7 = scalar_select %p55_p12, %s968_s21, %s57_s28  }
  0x24   : > { %p1083_p2 = por %p158_p1, %p70_p8  ;;  %s178_s9 = sand.u32 1, %s968_s21  }
  0x25   : > { %1320 = sst [smem:[#allocation20_spill]] %s1081_s7  ;;  %s1092_s10 = sshll.u32 %s178_s9, 3 }
  0x26   : > { %s1321_s8 = scalar_select %p1083_p2, 1, 0 }
  0x27   : > { %s1095_s11 = sshll.u32 %s976_s23, 7  ;;  %p1099_p5 = pnand %p724_p4, %p1064_p9 }
  0x28   : > { %s197_s13 = sand.u32 1, %s980_s24   ;;  %s1323_s2 = sld [smem:[#allocation21_spill]] }
  0x29   : > { %s1322_s12 = scalar_select %p1099_p5, 1, 0 }
  0x2a   : > { %s201_s17 = scalar_lea.vmem [#allocation10], %s1092_s10  ;;  %s1115_s19 = scalar_lea.sflag [#allocation11], %s197_s13 }
  0x2b   : > { %s209_s18 = sshll.u32 %s201_s17, 4  ;;  %p1121_p9 = pneg %p1099_p5  ;;  %s1112_s18 = int_to_ptr.vmem [resolvable:$true] %s209_s18 }
  0x2e   : > { %s1108_s16 = scalar_lea.hbm %s1323_s2, %s1095_s11  ;;  %s807_s14 = scalar_lea.hbm %s1323_s2, 256 }
  0x2f   : > { %s802_s26 = scalar_lea.hbm %s1108_s16, 128  ;;  %p808_p12 = scmp.lt.u32.totalorder %s1108_s16, %s1323_s2 }
  0x30   : > { %p803_p8 = scmp.ne.s32.totalorder %s1108_s16, %s802_s26  ;;  %p809_p1 = scmp.lt.u32.totalorder %s807_s14, %s802_s26 }
  0x31   : > { %p811_p3 = scmp.lt.u32.totalorder %s802_s26, %s1108_s16 }
  0x32   : > { %p805_p10 = pnand %p1121_p9, %p803_p8  ;;  %p810_p4 = por %p809_p1, %p808_p12 }
  0x34   : > { %p806_p11 = pneg %p805_p10  ;;  %p812_p6 = por %p811_p3, %p810_p4 }
  0x36   : > { %p813_p7 = pnand %p812_p6, %p806_p11 }
  0x38   : > { %816 = shalt.err (!%p813_p7)
}
  0x39   : > { %s817_s13 = scalar_lea.vmem %s1112_s18, 128  ;;  %s983_s29 = smov [#allocation10]  }
  0x3a   : > { %p818_p8 = scmp.ne.s32.totalorder %s1112_s18, %s817_s13  ;;  %s822_s30 = sshll.u32 %s983_s29, 4  ;;  %s823_s30 = int_to_ptr.vmem [resolvable:$false] %s822_s30 }
  0x3b   : > { %s824_s15 = scalar_lea.vmem %s823_s30, 256  ;;  %p825_p0 = scmp.lt.s32.totalorder %s1112_s18, %s823_s30 }
  0x3c   : > { %p820_p10 = pnand %p818_p8, %p1121_p9  ;;  %p826_p13 = scmp.lt.s32.totalorder %s824_s15, %s817_s13 }
  0x3e   : > { %p821_p2 = pneg %p820_p10  ;;  %p827_p12 = por %p826_p13, %p825_p0 }
  0x40   : > { %p828_p1 = pnand %p827_p12, %p821_p2 }
  0x42   : > { %831 = shalt.err (!%p828_p1)
}
  0x43   : > { %716 = dma.hbm_to_vmem [thread:$0]  (!%p1099_p5), %s1108_s16, 128, %s1112_s18, %s1115_s19  }
  0x44   : > { %p1325_p3 = scmp.lt.s32.totalorder %s980_s24, 3  ;;  %p1326_p6 = scmp.ge.s32.totalorder %s980_s24, 1 }
  0x45   : > { %s1157_s13 = scalar_lea.hbm %s1305_s1, %s1095_s11  ;;  %s182_s29 = scalar_lea.vmem [#allocation7], %s1092_s10 }
  0x46   : > { %p1149_p7 = pnand %p1326_p6, %p1325_p3  ;;  %s190_s30 = sshll.u32 %s182_s29, 4  ;;  %s1160_s30 = int_to_ptr.vmem [resolvable:$true] %s190_s30 }
  0x47   : > { %s1166_s15 = scalar_lea.hbm %s1307_s3, %s1095_s11  ;;  %s179_s2 = scalar_lea.sflag [#allocation8], %s178_s9 }
  0x48   : > { %s1327_s26 = scalar_select %p1149_p7, 1, 0 }
  0x49   : > { %s832_s27 = scalar_lea.hbm %s1157_s13, 128  ;;  %s837_s23 = scalar_lea.hbm %s1305_s1, 256 }
  0x4a   : > { %p833_p13 = scmp.ne.s32.totalorder %s1157_s13, %s832_s27  ;;  %p838_p11 = scmp.lt.u32.totalorder %s1157_s13, %s1305_s1 }
  0x4b   : > { %p839_p4 = scmp.lt.u32.totalorder %s837_s23, %s832_s27  ;;  %p841_p10 = scmp.lt.u32.totalorder %s832_s27, %s1157_s13 }
  0x4c   : > { %p835_p0 = pnand %p833_p13, %p1121_p9 }
  0x4d   : > { %p840_p8 = por %p839_p4, %p838_p11 }
  0x4e   : > { %p836_p2 = pneg %p835_p0 }
  0x4f   : > { %p842_p12 = por %p841_p10, %p840_p8 }
  0x51   : > { %p843_p1 = pnand %p842_p12, %p836_p2 }
  0x53   : > { %846 = shalt.err (!%p843_p1)
}
  0x54   : > { %s847_s9 = scalar_lea.vmem %s1160_s30, 128  ;;  %s984_s11 = smov [#allocation7]  }
  0x55   : > { %p848_p3 = scmp.ne.s32.totalorder %s1160_s30, %s847_s9  ;;  %s852_s16 = sshll.u32 %s984_s11, 4  ;;  %s853_s16 = int_to_ptr.vmem [resolvable:$false] %s852_s16 }
  0x56   : > { %s854_s7 = scalar_lea.vmem %s853_s16, 256  ;;  %p855_p0 = scmp.lt.s32.totalorder %s1160_s30, %s853_s16 }
  0x57   : > { %p850_p6 = pnand %p848_p3, %p1121_p9  ;;  %p856_p7 = scmp.lt.s32.totalorder %s854_s7, %s847_s9 }
  0x59   : > { %p851_p13 = pneg %p850_p6  ;;  %p857_p11 = por %p856_p7, %p855_p0 }
  0x5b   : > { %p858_p4 = pnand %p857_p11, %p851_p13 }
  0x5d   : > { %861 = shalt.err (!%p858_p4)
}
  0x5e   : > { %713 = dma.hbm_to_vmem [thread:$0]  (!%p1099_p5), %s1157_s13, 128, %s1160_s30, %s179_s2  }
  0x5f   : > { %s220_s23 = scalar_lea.vmem [#allocation12], %s1092_s10  ;;  %s862_s18 = scalar_lea.hbm %s1166_s15, 128 }
  0x60   : > { %s228_s27 = sshll.u32 %s220_s23, 4  ;;  %p863_p2 = scmp.ne.s32.totalorder %s1166_s15, %s862_s18  ;;  %s229_s27 = int_to_ptr.vmem [resolvable:$true] %s228_s27 }
  0x61   : > { %s867_s29 = scalar_lea.hbm %s1307_s3, 256  ;;  %p868_p10 = scmp.lt.u32.totalorder %s1166_s15, %s1307_s3 }
  0x62   : > { %p865_p7 = pnand %p863_p2, %p1121_p9  ;;  %p869_p12 = scmp.lt.u32.totalorder %s867_s29, %s862_s18 }
  0x63   : > { %p871_p3 = scmp.lt.u32.totalorder %s862_s18, %s1166_s15 }
  0x64   : > { %p866_p8 = pneg %p865_p7  ;;  %p870_p1 = por %p869_p12, %p868_p10 }
  0x66   : > { %p872_p6 = por %p871_p3, %p870_p1 }
  0x68   : > { %p873_p13 = pnand %p872_p6, %p866_p8 }
  0x6a   : > { %876 = shalt.err (!%p873_p13)
}
  0x6b   : > { %s877_s2 = scalar_lea.vmem %s229_s27, 128  ;;  %s985_s10 = smov [#allocation12]  }
  0x6c   : > { %p878_p0 = scmp.ne.s32.totalorder %s229_s27, %s877_s2  ;;  %s882_s13 = sshll.u32 %s985_s10, 4  ;;  %s883_s13 = int_to_ptr.vmem [resolvable:$false] %s882_s13 }
  0x6d   : > { %s884_s30 = scalar_lea.vmem %s883_s13, 256  ;;  %p885_p2 = scmp.lt.s32.totalorder %s229_s27, %s883_s13 }
  0x6e   : > { %p880_p11 = pnand %p878_p0, %p1121_p9  ;;  %p886_p7 = scmp.lt.s32.totalorder %s884_s30, %s877_s2 }
  0x70   : > { %p881_p4 = pneg %p880_p11  ;;  %p887_p5 = por %p886_p7, %p885_p2 }
  0x72   : > { %p888_p10 = pnand %p887_p5, %p881_p4 }
  0x74   : > { %891 = shalt.err (!%p888_p10)
}
  0x75   : > { %p1328_p12 = scmp.ne.s32.totalorder %s1322_s12, 0  ;;  %p1329_p8 = scmp.ne.s32.totalorder %s1327_s26, 0 }
  0x76   : > { %s1213_s28 = sand.u32 (!%p1329_p8), 1, %s964_s20   ;;  %p1330_p5 = scmp.ne.s32.totalorder (!%p1329_p8), %s1318_s5, 0 }
  0x77   : > { %719 = dma.hbm_to_vmem [thread:$0]  (!%p1328_p12), %s1166_s15, 128, %s229_s27, %s1115_s19  }
  0x78   : > { %237 = sbr.rel (%p1329_p8) target bundleno = 1017 (0x3f9), region = 32  ;;  %s1216_s16 = sshll.u32 (!%p1329_p8), %s1213_s28, 3 }
  0x79   : > { %s240_s7 = scalar_lea.sflag (!%p1329_p8), [#allocation8], %s1213_s28  ;;  %s243_s23 = scalar_lea.vmem (!%p1329_p8), [#allocation7], %s1216_s16 }
  0x7f   : > { %947 = dma.done.wait (%p1330_p5), %s240_s7, 128  }
  0x80   : > { %949 = vsyncadd (%p1330_p5), %s240_s7, 4294967168  ;;  %s248_s12 = sand.u32 1, %s1052_s25   ;;  %s252_s26 = scalar_lea.vmem [#allocation10], %s1216_s16 }
  0x81   : > { %s249_s19 = scalar_lea.sflag [#allocation11], %s248_s12 }
  0x82   : > { %951 = dma.done.wait (%p1330_p5), %s249_s19, 256  }
  0x83   : > { %953 = vsyncadd (%p1330_p5), %s249_s19, 4294967040  ;;  %vm298_vm0 = vcmask 7168   ;;  %s303_s15 = sld [smem:[#allocation6 + %s972_s22]]  ;;  %v986_v0 = vmov -inf   ;;  %v987_v1 = vmov 0.0   ;;  %vm301_vm1 = vcmask 261120  }
  0x84   : > { %299 = vst.msk [vmem:[#allocation2] sm:$0xff] %vm298_vm0, %v986_v0  ;;  %300 = vst.msk [vmem:[#allocation3] sm:$0xff] %vm298_vm0, %v987_v1  ;;  %s261_s25 = scalar_lea.vmem [#allocation12], %s1216_s16  ;;  %s293_s5 = scalar_lea.vmem [#allocation13], %s1216_s16 }
  0x85   : > { %302 = vst.msk [vmem:[#allocation4] sm:$0xff] %vm301_vm1, %v987_v1 }
  0x89   : > { %p680_p9 = scmp.gt.s32.totalorder %s303_s15, 0  ;;  %p306_p1 = scmp.le.s32.totalorder %s303_s15, 0 }
  0x8b   : > { %p307_p3 = por %p680_p9, %p306_p1 }
  0x8c   : > { %v313_v2 = vld [vmem:[%s252_s26] sm:$0xff] (%p307_p3)  ;;  %v311_v3 = vld [vmem:[%s243_s23] sm:$0xff] (%p307_p3)  ;;  %v988_v4 = vmov (%p307_p3), 0.0   ;;  %vm989_vm2 = vmmov (%p307_p3), 0   ;;  %v392_v6 = vlaneseq (%p307_p3)  ;;  %v395_v8 = vstv (%p307_p3), %s303_s15 }
  0x8d   : > { %310 = sbr.rel (!%p307_p3) target bundleno = 861 (0x35d), region = 52  ;;  %692 = vmatprep.subr.mxu0 (%p307_p3), %v988_v4  ;;  %694 = vmatprep.mubr.msk.f32.mxu0 (%p307_p3), %vm989_vm2, %v988_v4  ;;  %v312_v5 = vmul.f32 (%p307_p3), 0.17677669, %v311_v3  ;;  %vm401_vm4 = vcmask (%p307_p3), 64512   ;;  %v990_v13 = vmov (%p307_p3), 0   ;;  %v400_v14 = vld [vmem:[#allocation2] sm:$0xff] (%p307_p3) }
  0x8e   : > { %693 = vmatpush3.xpose.msk.msra.mxu0 (%p307_p3), %vm301_vm1, %v313_v2  ;;  %697 = vmatprep.subr.mxu1 (%p307_p3), %v988_v4  ;;  %v393_v7 = vand.u32 (%p307_p3), 127, %v392_v6  ;;  %v314_v18 = vld [vmem:[%s261_s25] sm:$0xff] (%p307_p3)  ;;  %v417_v26 = vld [vmem:[#allocation3] sm:$0xff] (%p307_p3)  ;;  %v425_v30 = vld [vmem:[#allocation4] sm:$0xff] (%p307_p3) }
  0x8f   : > { %699 = vmatprep.mubr.msk.f32.mxu1 (%p307_p3), %vm989_vm2, %v988_v4  ;;  %781 = vset.pattern.permute.xlu0 (%p307_p3), %v990_v13 }
  0x90   : > { %vm396_vm3 = vcmp.lt.s32.totalorder (%p307_p3), %v393_v7, %v395_v8  ;;  %782 = vset.pattern.permute.xlu1 (%p307_p3), %v990_v13  ;;  %698 = vmatpush3.msra.mxu1 (%p307_p3), %v314_v18 }
  0x91   : > { %695 = vmatmul.mubr.msk.f32.vlgmr.msra.gmra.mrb[0].mxu0 (%p307_p3), %vm301_vm1, %v312_v5 }
 0x164   : > { %v388_v9 = vpop.f32.mrb[0].mxu0 }
 0x165   : > { %v399_v10 = vsel %vm396_vm3, %v388_v9, -1000000.0  ;;  %v696_v11 = vpop.f32.mrb[1].mxu0 }
 0x166   : > { %v402_v12 = vsel %vm401_vm4, %v399_v10, -inf }
 0x167   : > { %403 = vmax.xlane.f32.xlu0 %v402_v12 }
 0x1f4   : > { %v404_v15 = vpop.xlane.xlu0 %403 }
 0x1f5   : > { %v405_v16 = vmax.f32 %v400_v14, %v404_v15 }
 0x1f7   : > { %v406_v17 = vsub.f32 %v400_v14, %v405_v16  ;;  %507 = vst.msk [vmem:[#allocation2] sm:$0xff] %vm298_vm0, %v405_v16  ;;  %411 = vperm.xlu0 %781, %v405_v16  }
 0x1f9   : > { %v407_v24 = vmul.f32 1.442695, %v406_v17 }
 0x276   : > { %v412_v19 = vpop.permute.xlu0 %411 }
 0x277   : > { %v414_v20 = vsub.f32 %v399_v10, %v412_v19 }
 0x279   : > { %v415_v21 = vmul.f32 1.442695, %v414_v20 }
 0x27b   : > { %783 = vpow2.f32 %v415_v21 }
 0x27c   : > { %785 = vpow2.f32 %v407_v24 }
 0x285   : > { %v784_v22 = vpop.eup %783 }
 0x286   : > { %700 = vmatmul.mubr.msk.f32.vlgmr.msra.gmra.mrb[0].mxu1 %vm401_vm4, %v784_v22  ;;  %v419_v23 = vsel %vm401_vm4, %v784_v22, 0.0  ;;  %v786_v25 = vpop.eup %785 }
 0x287   : > { %420 = vadd.xlane.f32.xlu1 %v419_v23  ;;  %v418_v27 = vmul.f32 %v786_v25, %v417_v26 }
 0x298   : > { %428 = vperm.xlu1 %782, %v786_v25  }
 0x314   : > { %v421_v28 = vpop.xlane.xlu1 %420 }
 0x315   : > { %v422_v29 = vadd.f32 %v421_v28, %v418_v27 }
 0x317   : > { %424 = vst.msk [vmem:[#allocation3] sm:$0xff] %vm298_vm0, %v422_v29 }
 0x318   : > { %v429_v31 = vpop.permute.xlu1 %428 }
 0x319   : > { %v431_v32 = vmul.f32 %v429_v31, %v425_v30 }
 0x359   : > { %v501_v33 = vpop.f32.mrb[0].mxu1 }
 0x35a   : > { %v505_v34 = vadd.f32 %v501_v33, %v431_v32  ;;  %v701_v35 = vpop.f32.mrb[1].mxu1 }
 0x35c   : > { %506 = vst.msk [vmem:[#allocation4] sm:$0xff] %vm301_vm1, %v505_v34 }
 0x35d PF: > { %v511_v36 = vld [vmem:[#allocation3] sm:$0xff]  ;;  %v991_v37 = vmov 0   ;;  %s685_s27 = sshll.u32 %s972_s22, 7  ;;  %s537_s18 = sshll.u32 %s293_s5, 4  ;;  %s1254_s18 = int_to_ptr.vmem [resolvable:$true] %s537_s18 }
 0x35e   : > { %787 = vset.pattern.permute.xlu0 %v991_v37  ;;  %788 = vrcp.f32 %v511_v36  ;;  %s1252_s29 = scalar_lea.hbm %s1308_s4, %s685_s27  ;;  %s523_s9 = scalar_lea.sflag [#allocation9], %s1213_s28 }
 0x35f   : > { %s892_s11 = scalar_lea.vmem %s1254_s18, 128  ;;  %p1331_p13 = scmp.ne.s32.totalorder %s1319_s6, 0 }
 0x360   : > { %p893_p6 = scmp.ne.s32.totalorder %s1254_s18, %s892_s11  ;;  %s992_s22 = smov [#allocation13]  }
 0x361   : > { %s896_s2 = sshll.u32 %s992_s22, 4  ;;  %s897_s2 = int_to_ptr.vmem [resolvable:$false] %s896_s2 }
 0x362   : > { %p894_p0 = pnand %p893_p6, %p1331_p13  ;;  %s898_s10 = scalar_lea.vmem %s897_s2, 256 }
 0x363   : > { %v513_v39 = vld [vmem:[#allocation4] sm:$0xff]  ;;  %p899_p4 = scmp.lt.s32.totalorder %s1254_s18, %s897_s2  ;;  %p900_p2 = scmp.lt.s32.totalorder %s898_s10, %s892_s11 }
 0x364   : > { %p895_p11 = pneg %p894_p0 }
 0x365   : > { %p901_p7 = por %p900_p2, %p899_p4 }
 0x367   : > { %p902_p10 = pnand %p901_p7, %p895_p11 }
 0x368   : > { %v789_v38 = vpop.eup %788 }
 0x369   : > { %516 = vperm.xlu0 %787, %v789_v38  }
 0x3e8   : > { %v517_v40 = vpop.permute.xlu0 %516 }
 0x3e9   : > { %v519_v41 = vmul.f32 %v517_v40, %v513_v39 }
 0x3eb   : > { %521 = vst.msk [vmem:[%s293_s5] sm:$0xff] %vm301_vm1, %v519_v41 }
 0x3ec   : > { %905 = shalt.err (!%p902_p10)
}
 0x3ed   : > { %s906_s13 = scalar_lea.hbm %s1252_s29, 128  ;;  %s910_s16 = scalar_lea.hbm %s1308_s4, 256 }
 0x3ee   : > { %p907_p12 = scmp.ne.s32.totalorder %s1252_s29, %s906_s13  ;;  %p911_p9 = scmp.lt.u32.totalorder %s1252_s29, %s1308_s4 }
 0x3ef   : > { %p912_p1 = scmp.lt.u32.totalorder %s910_s16, %s906_s13  ;;  %p914_p6 = scmp.lt.u32.totalorder %s906_s13, %s1252_s29 }
 0x3f0   : > { %p908_p8 = pnand %p907_p12, %p1331_p13 }
 0x3f1   : > { %p913_p3 = por %p912_p1, %p911_p9 }
 0x3f2   : > { %p909_p5 = pneg %p908_p8 }
 0x3f3   : > { %p915_p0 = por %p914_p6, %p913_p3 }
 0x3f5   : > { %p916_p11 = pnand %p915_p0, %p909_p5 }
 0x3f7   : > { %919 = shalt.err (!%p916_p11)
}
 0x3f8   : > { %708 = dma.vmem_to_hbm [thread:$0]  (%p1331_p13), %s1254_s18, 128, %s1252_s29, %s523_s9  }
 0x3f9 PF: > { %s549_s12 = sand.u32 1, %s960_s0   ;;  %p1332_p4 = scmp.ne.s32.totalorder %s1321_s8, 0 }
 0x3fa   : > { %p1333_p2 = scmp.ge.s32.totalorder %s980_s24, 2  ;;  %s550_s19 = scalar_lea.sflag [#allocation9], %s549_s12 }
 0x3fc   : > { %p721_p7 = pnand %p1333_p2, %p1332_p4 }
 0x3fe   : > { %955 = dma.done.wait (!%p721_p7), %s550_s19, 128  }
 0x3ff   : > { %957 = vsyncadd (!%p721_p7), %s550_s19, 4294967168  ;;  %s29_s24 = sadd.s32 1, %s980_s24   ;;  %s1334_s6 = sld [smem:[#allocation20_spill]] }
 0x400   : > { %p26_p10 = scmp.ge.s32.totalorder %s29_s24, 4   ;;  %s1335_s22 = sld [smem:[#allocation18_spill]] }
 0x401   : > { %s1336_s23 = sld [smem:[#allocation19_spill]]  ;;  %s1337_s0 = smov %s964_s20 }
 0x402   : > { %s1338_s20 = smov %s968_s21  ;;  %28 = sbr.rel (!%p26_p10) target bundleno = 23 (0x17), region = 113 }
 0x405   : > { %s1339_s21 = smov %s1334_s6 }
 0x409   :  { %555 = vsyncpa [#allocation8], 1 }
 0x40a   :  { %557 = vsyncpa [#allocation8 + $0x1], 1 }
 0x40b   :  { %558 = vsyncpa [#allocation11], 1 }
 0x40c   :  { %560 = vsyncpa [#allocation11 + $0x1], 1 }
 0x40d   :  { %561 = vsyncpa [#allocation9], 1 }
 0x40e   :  { %563 = vsyncpa [#allocation9 + $0x1], 1 }

</bundles_post_ra>
